<compile_context>
chip_gen: v7x
topology: tpu7x:2x2x1
jax: 0.10.0
libtpu: 0.0.40
codegen_flags: <defaults>
</compile_context>

<pallas_src>
import jax
import jax.numpy as jnp
from jax import lax
from jax.experimental import pallas as pl
from jax.experimental.pallas import tpu as pltpu


# ----------------------------------------------------------------------------
# Fused kernel: grid axis = samples ("arbitrary").
#   s == 0        : run encoder once, fill persistent VMEM scratch
#                   (a_candidate, scaled mu/sigma), zero the accumulator.
#   every s       : decode sample, run the two GCN layers on a_hat, accumulate.
#   s == S - 1    : mean over samples and single fc projection -> y.
# Weights arrive pre-transposed (fan_in, fan_out) so no in-kernel transposes.
# ----------------------------------------------------------------------------
def _bronx_kernel(eps_ref, a_ref, h_ref, w0t_ref, w1t_ref, wmut_ref, wlst_ref,
                  wfct_ref, y_ref, acand_sc, mu_sc, sigma_sc, acc_sc):
    s = pl.program_id(0)
    n_samples = pl.num_programs(0)
    hid = mu_sc.shape[-1]
    scale = jnp.float32(float(hid) ** -0.25)   # folds 1/sqrt(H) into z

    # ---- encoder + candidate graph (runs once, results persist in VMEM) ----
    @pl.when(s == 0)
    def _():
        a = a_ref[...]                                            # (N, N)

        # candidate(a): k=3 -> two squarings -> a^4, then clamp to [0, 1]
        a2 = jnp.dot(a, a, preferred_element_type=jnp.float32)
        a4 = jnp.dot(a2, a2, preferred_element_type=jnp.float32)
        acand_sc[...] = jnp.clip(a4, 0.0, 1.0)

        # GCN symmetric normalization (same `a` for both layers)
        d = jnp.maximum(jnp.sum(a, axis=-1, keepdims=True), 1.0)  # (N, 1)
        norm = lax.rsqrt(d)

        h = h_ref[...]                                            # (N, F)

        # GCN0 (ReLU)
        t = jnp.dot(h * norm, w0t_ref[...], preferred_element_type=jnp.float32)
        t = jnp.dot(a, t, preferred_element_type=jnp.float32) * norm
        h0 = jnp.maximum(t, 0.0)

        # GCN1 (no activation)
        t = jnp.dot(h0 * norm, w1t_ref[...], preferred_element_type=jnp.float32)
        h1 = jnp.dot(a, t, preferred_element_type=jnp.float32) * norm

        # mu / sigma pre-scaled by H^-0.25 so (z z^T) already carries 1/sqrt(H)
        mu_sc[...] = jnp.dot(h1, wmut_ref[...],
                             preferred_element_type=jnp.float32) * scale
        sigma_sc[...] = jnp.exp(
            jnp.dot(h1, wlst_ref[...],
                    preferred_element_type=jnp.float32)) * scale

        acc_sc[...] = jnp.zeros_like(acc_sc)

    # ---- per-sample decode + GCN pass on reconstructed graph ---------------
    eps = eps_ref[...]                                            # (N, H)
    z = mu_sc[...] + sigma_sc[...] * eps                          # scaled rsample

    # z z^T without materializing a transpose; logits already /= sqrt(H)
    logits = lax.dot_general(z, z, (((1,), (1,)), ((), ())),
                             preferred_element_type=jnp.float32)  # (N, N)
    # sigmoid(x) = 0.5 * (tanh(x/2) + 1)  (single EUP transcendental)
    a_hat = (0.5 * (jnp.tanh(0.5 * logits) + 1.0)) * acand_sc[...]

    d = jnp.maximum(jnp.sum(a_hat, axis=-1, keepdims=True), 1.0)
    norm = lax.rsqrt(d)

    h = h_ref[...]

    # GCN0 (ReLU) on reconstructed graph
    t = jnp.dot(h * norm, w0t_ref[...], preferred_element_type=jnp.float32)
    t = jnp.dot(a_hat, t, preferred_element_type=jnp.float32) * norm
    g0 = jnp.maximum(t, 0.0)

    # GCN1 (no activation)
    t = jnp.dot(g0 * norm, w1t_ref[...], preferred_element_type=jnp.float32)
    g1 = jnp.dot(a_hat, t, preferred_element_type=jnp.float32) * norm

    acc_sc[...] += g1                                             # (N, H) lane-dense

    # ---- finalize: mean over samples, single fc projection ------------------
    @pl.when(s == n_samples - 1)
    def _():
        g_mean = acc_sc[...] * (1.0 / jnp.float32(n_samples))
        y_ref[...] = jnp.dot(g_mean, wfct_ref[...],
                             preferred_element_type=jnp.float32)


# ----------------------------------------------------------------------------
# Wrapper
# ----------------------------------------------------------------------------
def bronx_forward(a, h, eps, w0, w1, wmu, wls, wfc):
    N, F = h.shape
    S, _, H = eps.shape
    O = wfc.shape[0]

    # pre-transpose weights once on the host side (pure layout plumbing)
    w0t, w1t = w0.T, w1.T            # (F, H), (H, H)
    wmut, wlst = wmu.T, wls.T        # (H, H), (H, H)
    wfct = wfc.T                     # (H, O)

    full = lambda shape: pl.BlockSpec(shape, lambda s: (0,) * len(shape))

    y = pl.pallas_call(
        _bronx_kernel,
        out_shape=jax.ShapeDtypeStruct((N, O), jnp.float32),
        grid_spec=pltpu.PrefetchScalarGridSpec(
            num_scalar_prefetch=0,
            grid=(S,),
            in_specs=[
                pl.BlockSpec((None, N, H), lambda s: (s, 0, 0)),   # eps (per sample)
                full((N, N)),                                      # a
                full((N, F)),                                      # h
                full((F, H)),                                      # w0^T
                full((H, H)),                                      # w1^T
                full((H, H)),                                      # wmu^T
                full((H, H)),                                      # wls^T
                full((H, O)),                                      # wfc^T
            ],
            out_specs=full((N, O)),
            scratch_shapes=[
                pltpu.VMEM((N, N), jnp.float32),   # a_candidate (persists)
                pltpu.VMEM((N, H), jnp.float32),   # mu * H^-0.25
                pltpu.VMEM((N, H), jnp.float32),   # sigma * H^-0.25
                pltpu.VMEM((N, H), jnp.float32),   # sum_s g_s
            ],
        ),
        compiler_params=pltpu.CompilerParams(
            dimension_semantics=("arbitrary",),
            vmem_limit_bytes=32 * 1024 * 1024,
        ),
    )(eps, a, h, w0t, w1t, wmut, wlst, wfct)

    return y


# Pure-JAX reference (same math) for a sanity check.
def _reference(a, h, eps, w0, w1, wmu, wls, wfc):
    def gcn(a_, h_, w, act=False):
        d = jnp.maximum(jnp.sum(a_, axis=-1), 1.0)
        norm = d[..., None] ** -0.5
        x = (h_ * norm) @ w.T
        x = jnp.matmul(a_, x) * norm
        return jnp.maximum(x, 0.0) if act else x

    a2 = a @ a
    acand = jnp.clip(a2 @ a2, 0.0, 1.0)
    h1 = gcn(a, gcn(a, h, w0, True), w1)
    mu, sigma = h1 @ wmu.T, jnp.exp(h1 @ wls.T)
    z = mu[None] + sigma[None] * eps
    a_hat = jax.nn.sigmoid(
        jnp.einsum("snh,smh->snm", z, z) / z.shape[-1] ** 0.5) * acand[None]
    g = gcn(a_hat, gcn(a_hat, h[None], w0, True), w1)
    return jnp.mean(g @ wfc.T, axis=0)


if __name__ == "__main__":
    N, F, H, O = 16, 8, 32, 4       # nodes, in_features, hidden_features, out_features
    n_samples = 2

    key = jax.random.PRNGKey(0)
    k_a, k_h, k_eps, k0, k1, k2, k3, k4 = jax.random.split(key, 8)

    # deterministic synthetic graph (symmetric 0/1 adjacency with self-loops)
    a_rand = jax.random.uniform(k_a, (N, N))
    a = ((a_rand + a_rand.T) > 1.4).astype(jnp.float32)
    a = jnp.clip(a + jnp.eye(N, dtype=jnp.float32), 0.0, 1.0)

    h = jax.random.normal(k_h, (N, F), dtype=jnp.float32)
    eps = jax.random.normal(k_eps, (n_samples, N, H), dtype=jnp.float32)

    def xavier(k, shape):
        fan_out, fan_in = shape
        lim = (6.0 / (fan_in + fan_out)) ** 0.5
        return jax.random.uniform(k, shape, jnp.float32, -lim, lim)

    w0 = xavier(k0, (H, F))    # vgae.gcn0.fc.weight
    w1 = xavier(k1, (H, H))    # vgae.gcn1.fc.weight
    wmu = xavier(k2, (H, H))   # vgae.fc_mu.weight
    wls = xavier(k3, (H, H))   # vgae.fc_log_sigma.weight
    wfc = xavier(k4, (O, H))   # bronx.fc.weight

    y = bronx_forward(a, h, eps, w0, w1, wmu, wls, wfc)
    y = jax.block_until_ready(y)

    y_ref = _reference(a, h, eps, w0, w1, wmu, wls, wfc)
    assert y.shape == (N, O)
    assert jnp.allclose(y, y_ref, rtol=2e-3, atol=2e-3)

    print("KERNEL_OK")
</pallas_src>

<mosaic_0001>
module attributes {stable_mosaic.version = 11 : i64} {
  func.func @_bronx_kernel(%arg0: i32, %arg1: memref<1x16x32xf32, #tpu.memory_space<vmem>>, %arg2: memref<16x16xf32, #tpu.memory_space<vmem>>, %arg3: memref<16x8xf32, #tpu.memory_space<vmem>>, %arg4: memref<8x32xf32, #tpu.memory_space<vmem>>, %arg5: memref<32x32xf32, #tpu.memory_space<vmem>>, %arg6: memref<32x32xf32, #tpu.memory_space<vmem>>, %arg7: memref<32x32xf32, #tpu.memory_space<vmem>>, %arg8: memref<32x4xf32, #tpu.memory_space<vmem>>, %arg9: memref<16x4xf32, #tpu.memory_space<vmem>>, %arg10: memref<16x16xf32, #tpu.memory_space<vmem>>, %arg11: memref<16x32xf32, #tpu.memory_space<vmem>>, %arg12: memref<16x32xf32, #tpu.memory_space<vmem>>, %arg13: memref<16x32xf32, #tpu.memory_space<vmem>>) attributes {dimension_semantics = [#tpu.dimension_semantics<arbitrary>], iteration_bounds = array<i64: 2>, scalar_prefetch = 0 : i64, scratch_operands = 4 : i64, tpu.core_type = #tpu.core_type<tc>, window_params = [{transform_indices = @transform_0, window_bounds = array<i64: 1, 16, 32>}, {pipeline_mode = #tpu.pipeline_mode<synchronous>, transform_indices = @transform_1, window_bounds = array<i64: 16, 16>}, {pipeline_mode = #tpu.pipeline_mode<synchronous>, transform_indices = @transform_2, window_bounds = array<i64: 16, 8>}, {pipeline_mode = #tpu.pipeline_mode<synchronous>, transform_indices = @transform_3, window_bounds = array<i64: 8, 32>}, {pipeline_mode = #tpu.pipeline_mode<synchronous>, transform_indices = @transform_4, window_bounds = array<i64: 32, 32>}, {pipeline_mode = #tpu.pipeline_mode<synchronous>, transform_indices = @transform_5, window_bounds = array<i64: 32, 32>}, {pipeline_mode = #tpu.pipeline_mode<synchronous>, transform_indices = @transform_6, window_bounds = array<i64: 32, 32>}, {pipeline_mode = #tpu.pipeline_mode<synchronous>, transform_indices = @transform_7, window_bounds = array<i64: 32, 4>}, {pipeline_mode = #tpu.pipeline_mode<synchronous>, transform_indices = @transform_8, window_bounds = array<i64: 16, 4>}]} {
    %c0_i32 = arith.constant 0 : i32
    %0 = arith.cmpi eq, %arg0, %c0_i32 : i32
    %1 = arith.extui %0 : i1 to i32
    %cst = arith.constant 0.420448214 : f32
    %c0_i32_0 = arith.constant 0 : i32
    %2 = arith.cmpi ne, %1, %c0_i32_0 : i32
    scf.if %2 {
      %c0_31 = arith.constant 0 : index
      %c0_32 = arith.constant 0 : index
      %47 = vector.load %arg2[%c0_31, %c0_32] : memref<16x16xf32, #tpu.memory_space<vmem>>, vector<16x16xf32>
      %cst_33 = arith.constant dense<0.000000e+00> : vector<16x16xf32>
      %48 = tpu.matmul %47, %47, %cst_33 {dimension_numbers = #tpu.dot_dimension_numbers<[1], [0], [0], [1], [0, 0, 1, 1], [], []>} : vector<16x16xf32>, vector<16x16xf32>, vector<16x16xf32> -> vector<16x16xf32>
      %cst_34 = arith.constant dense<0.000000e+00> : vector<16x16xf32>
      %49 = tpu.matmul %48, %48, %cst_34 {dimension_numbers = #tpu.dot_dimension_numbers<[1], [0], [0], [1], [0, 0, 1, 1], [], []>} : vector<16x16xf32>, vector<16x16xf32>, vector<16x16xf32> -> vector<16x16xf32>
      %cst_35 = arith.constant 0.000000e+00 : f32
      %cst_36 = arith.constant 1.000000e+00 : f32
      %50 = vector.broadcast %cst_35 : f32 to vector<16x16xf32>
      %51 = arith.maximumf %50, %49 : vector<16x16xf32>
      %52 = vector.broadcast %cst_36 : f32 to vector<16x16xf32>
      %53 = arith.minimumf %52, %51 : vector<16x16xf32>
      %c0_37 = arith.constant 0 : index
      %c0_38 = arith.constant 0 : index
      %54 = vector.load %arg10[%c0_37, %c0_38] : memref<16x16xf32, #tpu.memory_space<vmem>>, vector<16x16xf32>
      tpu.vector_store %arg10[%c0_37, %c0_38], %53 {strides = array<i32>} : memref<16x16xf32, #tpu.memory_space<vmem>>, vector<16x16xf32>,
      %cst_39 = arith.constant dense<0.000000e+00> : vector<16xf32>
      %55 = vector.multi_reduction <add>, %47, %cst_39 [1] : vector<16x16xf32> to vector<16xf32>
      %56 = vector.shape_cast %55 : vector<16xf32> to vector<16x1xf32>
      %cst_40 = arith.constant 1.000000e+00 : f32
      %57 = vector.broadcast %cst_40 : f32 to vector<16x1xf32>
      %58 = arith.maximumf %56, %57 : vector<16x1xf32>
      %59 = math.rsqrt %58 : vector<16x1xf32>
      %c0_41 = arith.constant 0 : index
      %c0_42 = arith.constant 0 : index
      %60 = vector.load %arg3[%c0_41, %c0_42] : memref<16x8xf32, #tpu.memory_space<vmem>>, vector<16x8xf32>
      %61 = vector.broadcast %59 : vector<16x1xf32> to vector<16x8xf32>
      %62 = arith.mulf %60, %61 : vector<16x8xf32>
      %c0_43 = arith.constant 0 : index
      %c0_44 = arith.constant 0 : index
      %63 = vector.load %arg4[%c0_43, %c0_44] : memref<8x32xf32, #tpu.memory_space<vmem>>, vector<8x32xf32>
      %cst_45 = arith.constant dense<0.000000e+00> : vector<16x32xf32>
      %64 = tpu.matmul %62, %63, %cst_45 {dimension_numbers = #tpu.dot_dimension_numbers<[1], [0], [0], [1], [0, 0, 1, 1], [], []>} : vector<16x8xf32>, vector<8x32xf32>, vector<16x32xf32> -> vector<16x32xf32>
      %cst_46 = arith.constant dense<0.000000e+00> : vector<16x32xf32>
      %65 = tpu.matmul %47, %64, %cst_46 {dimension_numbers = #tpu.dot_dimension_numbers<[1], [0], [0], [1], [0, 0, 1, 1], [], []>} : vector<16x16xf32>, vector<16x32xf32>, vector<16x32xf32> -> vector<16x32xf32>
      %66 = vector.broadcast %59 : vector<16x1xf32> to vector<16x32xf32>
      %67 = arith.mulf %65, %66 : vector<16x32xf32>
      %cst_47 = arith.constant 0.000000e+00 : f32
      %68 = vector.broadcast %cst_47 : f32 to vector<16x32xf32>
      %69 = arith.maximumf %67, %68 : vector<16x32xf32>
      %70 = vector.broadcast %59 : vector<16x1xf32> to vector<16x32xf32>
      %71 = arith.mulf %69, %70 : vector<16x32xf32>
      %c0_48 = arith.constant 0 : index
      %c0_49 = arith.constant 0 : index
      %72 = vector.load %arg5[%c0_48, %c0_49] : memref<32x32xf32, #tpu.memory_space<vmem>>, vector<32x32xf32>
      %cst_50 = arith.constant dense<0.000000e+00> : vector<16x32xf32>
      %73 = tpu.matmul %71, %72, %cst_50 {dimension_numbers = #tpu.dot_dimension_numbers<[1], [0], [0], [1], [0, 0, 1, 1], [], []>} : vector<16x32xf32>, vector<32x32xf32>, vector<16x32xf32> -> vector<16x32xf32>
      %cst_51 = arith.constant dense<0.000000e+00> : vector<16x32xf32>
      %74 = tpu.matmul %47, %73, %cst_51 {dimension_numbers = #tpu.dot_dimension_numbers<[1], [0], [0], [1], [0, 0, 1, 1], [], []>} : vector<16x16xf32>, vector<16x32xf32>, vector<16x32xf32> -> vector<16x32xf32>
      %75 = vector.broadcast %59 : vector<16x1xf32> to vector<16x32xf32>
      %76 = arith.mulf %74, %75 : vector<16x32xf32>
      %c0_52 = arith.constant 0 : index
      %c0_53 = arith.constant 0 : index
      %77 = vector.load %arg6[%c0_52, %c0_53] : memref<32x32xf32, #tpu.memory_space<vmem>>, vector<32x32xf32>
      %cst_54 = arith.constant dense<0.000000e+00> : vector<16x32xf32>
      %78 = tpu.matmul %76, %77, %cst_54 {dimension_numbers = #tpu.dot_dimension_numbers<[1], [0], [0], [1], [0, 0, 1, 1], [], []>} : vector<16x32xf32>, vector<32x32xf32>, vector<16x32xf32> -> vector<16x32xf32>
      %79 = vector.broadcast %cst : f32 to vector<16x32xf32>
      %80 = arith.mulf %78, %79 : vector<16x32xf32>
      %c0_55 = arith.constant 0 : index
      %c0_56 = arith.constant 0 : index
      %81 = vector.load %arg11[%c0_55, %c0_56] : memref<16x32xf32, #tpu.memory_space<vmem>>, vector<16x32xf32>
      tpu.vector_store %arg11[%c0_55, %c0_56], %80 {strides = array<i32>} : memref<16x32xf32, #tpu.memory_space<vmem>>, vector<16x32xf32>,
      %c0_57 = arith.constant 0 : index
      %c0_58 = arith.constant 0 : index
      %82 = vector.load %arg7[%c0_57, %c0_58] : memref<32x32xf32, #tpu.memory_space<vmem>>, vector<32x32xf32>
      %cst_59 = arith.constant dense<0.000000e+00> : vector<16x32xf32>
      %83 = tpu.matmul %76, %82, %cst_59 {dimension_numbers = #tpu.dot_dimension_numbers<[1], [0], [0], [1], [0, 0, 1, 1], [], []>} : vector<16x32xf32>, vector<32x32xf32>, vector<16x32xf32> -> vector<16x32xf32>
      %84 = math.exp %83 : vector<16x32xf32>
      %85 = vector.broadcast %cst : f32 to vector<16x32xf32>
      %86 = arith.mulf %84, %85 : vector<16x32xf32>
      %c0_60 = arith.constant 0 : index
      %c0_61 = arith.constant 0 : index
      %87 = vector.load %arg12[%c0_60, %c0_61] : memref<16x32xf32, #tpu.memory_space<vmem>>, vector<16x32xf32>
      tpu.vector_store %arg12[%c0_60, %c0_61], %86 {strides = array<i32>} : memref<16x32xf32, #tpu.memory_space<vmem>>, vector<16x32xf32>,
      %cst_62 = arith.constant 0.000000e+00 : f32
      %88 = vector.broadcast %cst_62 : f32 to vector<16x32xf32>
      %c0_63 = arith.constant 0 : index
      %c0_64 = arith.constant 0 : index
      %89 = vector.load %arg13[%c0_63, %c0_64] : memref<16x32xf32, #tpu.memory_space<vmem>>, vector<16x32xf32>
      tpu.vector_store %arg13[%c0_63, %c0_64], %88 {strides = array<i32>} : memref<16x32xf32, #tpu.memory_space<vmem>>, vector<16x32xf32>,
    } else {
    }
    %c0 = arith.constant 0 : index
    %c0_1 = arith.constant 0 : index
    %c0_2 = arith.constant 0 : index
    %3 = vector.load %arg1[%c0, %c0_1, %c0_2] : memref<1x16x32xf32, #tpu.memory_space<vmem>>, vector<1x16x32xf32>
    %4 = vector.shape_cast %3 : vector<1x16x32xf32> to vector<16x32xf32>
    %c0_3 = arith.constant 0 : index
    %c0_4 = arith.constant 0 : index
    %5 = vector.load %arg11[%c0_3, %c0_4] : memref<16x32xf32, #tpu.memory_space<vmem>>, vector<16x32xf32>
    %c0_5 = arith.constant 0 : index
    %c0_6 = arith.constant 0 : index
    %6 = vector.load %arg12[%c0_5, %c0_6] : memref<16x32xf32, #tpu.memory_space<vmem>>, vector<16x32xf32>
    %7 = arith.mulf %6, %4 : vector<16x32xf32>
    %8 = arith.addf %5, %7 : vector<16x32xf32>
    %cst_7 = arith.constant dense<0.000000e+00> : vector<16x16xf32>
    %9 = tpu.matmul %8, %8, %cst_7 {dimension_numbers = #tpu.dot_dimension_numbers<[1], [1], [0], [0], [0, 0, 1, 0], [], []>} : vector<16x32xf32>, vector<16x32xf32>, vector<16x16xf32> -> vector<16x16xf32>
    %cst_8 = arith.constant 5.000000e-01 : f32
    %10 = vector.broadcast %cst_8 : f32 to vector<16x16xf32>
    %11 = arith.mulf %10, %9 : vector<16x16xf32>
    %12 = math.tanh %11 : vector<16x16xf32>
    %cst_9 = arith.constant 1.000000e+00 : f32
    %13 = vector.broadcast %cst_9 : f32 to vector<16x16xf32>
    %14 = arith.addf %12, %13 : vector<16x16xf32>
    %cst_10 = arith.constant 5.000000e-01 : f32
    %15 = vector.broadcast %cst_10 : f32 to vector<16x16xf32>
    %16 = arith.mulf %15, %14 : vector<16x16xf32>
    %c0_11 = arith.constant 0 : index
    %c0_12 = arith.constant 0 : index
    %17 = vector.load %arg10[%c0_11, %c0_12] : memref<16x16xf32, #tpu.memory_space<vmem>>, vector<16x16xf32>
    %18 = arith.mulf %16, %17 : vector<16x16xf32>
    %cst_13 = arith.constant dense<0.000000e+00> : vector<16xf32>
    %19 = vector.multi_reduction <add>, %18, %cst_13 [1] : vector<16x16xf32> to vector<16xf32>
    %20 = vector.shape_cast %19 : vector<16xf32> to vector<16x1xf32>
    %cst_14 = arith.constant 1.000000e+00 : f32
    %21 = vector.broadcast %cst_14 : f32 to vector<16x1xf32>
    %22 = arith.maximumf %20, %21 : vector<16x1xf32>
    %23 = math.rsqrt %22 : vector<16x1xf32>
    %c0_15 = arith.constant 0 : index
    %c0_16 = arith.constant 0 : index
    %24 = vector.load %arg3[%c0_15, %c0_16] : memref<16x8xf32, #tpu.memory_space<vmem>>, vector<16x8xf32>
    %25 = vector.broadcast %23 : vector<16x1xf32> to vector<16x8xf32>
    %26 = arith.mulf %24, %25 : vector<16x8xf32>
    %c0_17 = arith.constant 0 : index
    %c0_18 = arith.constant 0 : index
    %27 = vector.load %arg4[%c0_17, %c0_18] : memref<8x32xf32, #tpu.memory_space<vmem>>, vector<8x32xf32>
    %cst_19 = arith.constant dense<0.000000e+00> : vector<16x32xf32>
    %28 = tpu.matmul %26, %27, %cst_19 {dimension_numbers = #tpu.dot_dimension_numbers<[1], [0], [0], [1], [0, 0, 1, 1], [], []>} : vector<16x8xf32>, vector<8x32xf32>, vector<16x32xf32> -> vector<16x32xf32>
    %cst_20 = arith.constant dense<0.000000e+00> : vector<16x32xf32>
    %29 = tpu.matmul %18, %28, %cst_20 {dimension_numbers = #tpu.dot_dimension_numbers<[1], [0], [0], [1], [0, 0, 1, 1], [], []>} : vector<16x16xf32>, vector<16x32xf32>, vector<16x32xf32> -> vector<16x32xf32>
    %30 = vector.broadcast %23 : vector<16x1xf32> to vector<16x32xf32>
    %31 = arith.mulf %29, %30 : vector<16x32xf32>
    %cst_21 = arith.constant 0.000000e+00 : f32
    %32 = vector.broadcast %cst_21 : f32 to vector<16x32xf32>
    %33 = arith.maximumf %31, %32 : vector<16x32xf32>
    %34 = vector.broadcast %23 : vector<16x1xf32> to vector<16x32xf32>
    %35 = arith.mulf %33, %34 : vector<16x32xf32>
    %c0_22 = arith.constant 0 : index
    %c0_23 = arith.constant 0 : index
    %36 = vector.load %arg5[%c0_22, %c0_23] : memref<32x32xf32, #tpu.memory_space<vmem>>, vector<32x32xf32>
    %cst_24 = arith.constant dense<0.000000e+00> : vector<16x32xf32>
    %37 = tpu.matmul %35, %36, %cst_24 {dimension_numbers = #tpu.dot_dimension_numbers<[1], [0], [0], [1], [0, 0, 1, 1], [], []>} : vector<16x32xf32>, vector<32x32xf32>, vector<16x32xf32> -> vector<16x32xf32>
    %cst_25 = arith.constant dense<0.000000e+00> : vector<16x32xf32>
    %38 = tpu.matmul %18, %37, %cst_25 {dimension_numbers = #tpu.dot_dimension_numbers<[1], [0], [0], [1], [0, 0, 1, 1], [], []>} : vector<16x16xf32>, vector<16x32xf32>, vector<16x32xf32> -> vector<16x32xf32>
    %39 = vector.broadcast %23 : vector<16x1xf32> to vector<16x32xf32>
    %40 = arith.mulf %38, %39 : vector<16x32xf32>
    %c0_26 = arith.constant 0 : index
    %c0_27 = arith.constant 0 : index
    %41 = vector.load %arg13[%c0_26, %c0_27] : memref<16x32xf32, #tpu.memory_space<vmem>>, vector<16x32xf32>
    %42 = arith.addf %41, %40 : vector<16x32xf32>
    %c0_28 = arith.constant 0 : index
    %c0_29 = arith.constant 0 : index
    %43 = vector.load %arg13[%c0_28, %c0_29] : memref<16x32xf32, #tpu.memory_space<vmem>>, vector<16x32xf32>
    tpu.vector_store %arg13[%c0_28, %c0_29], %42 {strides = array<i32>} : memref<16x32xf32, #tpu.memory_space<vmem>>, vector<16x32xf32>,
    %c1_i32 = arith.constant 1 : i32
    %44 = arith.cmpi eq, %arg0, %c1_i32 : i32
    %45 = arith.extui %44 : i1 to i32
    %c0_i32_30 = arith.constant 0 : i32
    %46 = arith.cmpi ne, %45, %c0_i32_30 : i32
    scf.if %46 {
      %c0_31 = arith.constant 0 : index
      %c0_32 = arith.constant 0 : index
      %47 = vector.load %arg13[%c0_31, %c0_32] : memref<16x32xf32, #tpu.memory_space<vmem>>, vector<16x32xf32>
      %cst_33 = arith.constant 1.000000e+00 : f32
      %cst_34 = arith.constant 2.000000e+00 : f32
      %48 = arith.divf %cst_33, %cst_34 : f32
      %49 = vector.broadcast %48 : f32 to vector<16x32xf32>
      %50 = arith.mulf %47, %49 : vector<16x32xf32>
      %c0_35 = arith.constant 0 : index
      %c0_36 = arith.constant 0 : index
      %51 = vector.load %arg8[%c0_35, %c0_36] : memref<32x4xf32, #tpu.memory_space<vmem>>, vector<32x4xf32>
      %cst_37 = arith.constant dense<0.000000e+00> : vector<16x4xf32>
      %52 = tpu.matmul %50, %51, %cst_37 {dimension_numbers = #tpu.dot_dimension_numbers<[1], [0], [0], [1], [0, 0, 1, 1], [], []>} : vector<16x32xf32>, vector<32x4xf32>, vector<16x4xf32> -> vector<16x4xf32>
      %c0_38 = arith.constant 0 : index
      %c0_39 = arith.constant 0 : index
      %53 = vector.load %arg9[%c0_38, %c0_39] : memref<16x4xf32, #tpu.memory_space<vmem>>, vector<16x4xf32>
      tpu.vector_store %arg9[%c0_38, %c0_39], %52 {strides = array<i32>} : memref<16x4xf32, #tpu.memory_space<vmem>>, vector<16x4xf32>,
    } else {
    }
    return
  }
  func.func @transform_0(%arg0: i32) -> (i32, i32, i32) {
    %c0_i32 = arith.constant 0 : i32
    %c0_i32_0 = arith.constant 0 : i32
    %c0_i32_1 = arith.constant 0 : i32
    return %arg0, %c0_i32, %c0_i32_0 : i32, i32, i32
  }
  func.func @transform_1(%arg0: i32) -> (i32, i32) {
    %c0_i32 = arith.constant 0 : i32
    %c0_i32_0 = arith.constant 0 : i32
    %c0_i32_1 = arith.constant 0 : i32
    return %c0_i32, %c0_i32_0 : i32, i32
  }
  func.func @transform_2(%arg0: i32) -> (i32, i32) {
    %c0_i32 = arith.constant 0 : i32
    %c0_i32_0 = arith.constant 0 : i32
    %c0_i32_1 = arith.constant 0 : i32
    return %c0_i32, %c0_i32_0 : i32, i32
  }
  func.func @transform_3(%arg0: i32) -> (i32, i32) {
    %c0_i32 = arith.constant 0 : i32
    %c0_i32_0 = arith.constant 0 : i32
    %c0_i32_1 = arith.constant 0 : i32
    return %c0_i32, %c0_i32_0 : i32, i32
  }
  func.func @transform_4(%arg0: i32) -> (i32, i32) {
    %c0_i32 = arith.constant 0 : i32
    %c0_i32_0 = arith.constant 0 : i32
    %c0_i32_1 = arith.constant 0 : i32
    return %c0_i32, %c0_i32_0 : i32, i32
  }
  func.func @transform_5(%arg0: i32) -> (i32, i32) {
    %c0_i32 = arith.constant 0 : i32
    %c0_i32_0 = arith.constant 0 : i32
    %c0_i32_1 = arith.constant 0 : i32
    return %c0_i32, %c0_i32_0 : i32, i32
  }
  func.func @transform_6(%arg0: i32) -> (i32, i32) {
    %c0_i32 = arith.constant 0 : i32
    %c0_i32_0 = arith.constant 0 : i32
    %c0_i32_1 = arith.constant 0 : i32
    return %c0_i32, %c0_i32_0 : i32, i32
  }
  func.func @transform_7(%arg0: i32) -> (i32, i32) {
    %c0_i32 = arith.constant 0 : i32
    %c0_i32_0 = arith.constant 0 : i32
    %c0_i32_1 = arith.constant 0 : i32
    return %c0_i32, %c0_i32_0 : i32, i32
  }
  func.func @transform_8(%arg0: i32) -> (i32, i32) {
    %c0_i32 = arith.constant 0 : i32
    %c0_i32_0 = arith.constant 0 : i32
    %c0_i32_1 = arith.constant 0 : i32
    return %c0_i32, %c0_i32_0 : i32, i32
  }
}

</mosaic_0001>

<bundles_post_ra>
// kernel: tpu_custom_call.1
= control target key start
LH: loop header
LB: loop body
LE: loop exit
PB: predicated region body
PF: predicated region fallthrough
CT: control target
= control target key end

     0   :  { %13 = vsyncpa [#allocation7], 0  ;;  %s2490_s0 = inlined_call_operand.vmem [shape: f32[2,16,32], index: 0, kind: input, shape index: {}]   ;;  %s2491_s1 = inlined_call_operand.hbm [shape: f32[16,16], index: 1, kind: input, shape index: {}]   ;;  %s2492_s2 = inlined_call_operand.vmem [shape: f32[16,8], index: 2, kind: input, shape index: {}]   ;;  %s2493_s3 = inlined_call_operand.hbm [shape: f32[8,32], index: 3, kind: input, shape index: {}]   ;;  %s2494_s4 = inlined_call_operand.vmem [shape: f32[32,32], index: 4, kind: input, shape index: {}]   ;;  %s2495_s5 = inlined_call_operand.hbm [shape: f32[32,32], index: 5, kind: input, shape index: {}]   ;;  %s2496_s6 = inlined_call_operand.hbm [shape: f32[32,32], index: 6, kind: input, shape index: {}]   ;;  %s2497_s7 = inlined_call_operand.vmem [shape: f32[32,4], index: 7, kind: input, shape index: {}]   ;;  %s2498_s8 = inlined_call_operand.vmem [shape: f32[16,4], index: 8, kind: output, shape index: {}]  }
   0x1   :  { %14 = vsyncpa [#allocation9], 0 }
   0x2   :  { %15 = vsyncpa [#allocation12], 0  ;;  %s2213_s27 = smov 0  }
   0x3 LB: > { %s2161_s28 = smov [#allocation8]   ;;  %s2219_s30 = sadd.s32 4294967295, %s2159_s27   ;;  %s2159_s27 = sphi %s2213_s27, %s21_s27  }
   0x4   : > { %s249_s29 = sshll.u32 %s2161_s28, 4  ;;  %p1665_p0 = scmp.ge.s32.totalorder %s2159_s27, 1  ;;  %s2225_s29 = int_to_ptr.vmem [resolvable:$true] %s249_s29 }
   0x5   : > { %p220_p1 = scmp.lt.s32.totalorder %s2159_s27, 3  ;;  %p2499_p3 = scmp.eq.s32.totalorder %s2219_s30, 0 }
   0x6   : > { %s2162_s10 = smov [#allocation6]   ;;  %s2163_s13 = smov [#allocation10]  }
   0x7   : > { %p2227_p4 = pnand %p1665_p0, %p220_p1  ;;  %s232_s11 = sshll.u32 %s2162_s10, 4  ;;  %s2233_s11 = int_to_ptr.vmem [resolvable:$true] %s232_s11 }
   0x8   : > { %s262_s14 = sshll.u32 %s2163_s13, 4  ;;  %s2164_s15 = smov [#allocation11]   ;;  %s2241_s14 = int_to_ptr.vmem [resolvable:$true] %s262_s14 }
   0x9   : > { %s2501_s9 = scalar_select %p2227_p4, 1, 0 }
   0xa   : > { %p1977_p5 = pneg %p2227_p4  ;;  %s2243_s16 = sshll.u32 %s2164_s15, 4  ;;  %s276_s16 = int_to_ptr.vmem [resolvable:$true] %s2243_s16 }
   0xb   : > { %s2029_s19 = scalar_lea.hbm %s2493_s3, 128 }
   0xc   : > { %p2237_p6 = pnand %p2499_p3, %p1977_p5  ;;  %p2030_p7 = scmp.ne.s32.totalorder %s2493_s3, %s2029_s19 }
   0xd   : > { %p2036_p11 = scmp.lt.u32.totalorder %s2029_s19, %s2493_s3 }
   0xe   : > { %p2253_p8 = pneg %p2237_p6 }
  0x10   : > { %p2032_p9 = pnand %p2253_p8, %p2030_p7 }
  0x12   : > { %p2033_p10 = pneg %p2032_p9 }
  0x14   : > { %p2038_p12 = pnand %p2036_p11, %p2033_p10 }
  0x16   : > { %2041 = shalt.err (!%p2038_p12)
}
  0x17   : > { %s2042_s25 = scalar_lea.vmem %s2225_s29, 128  ;;  %p2050_p5 = scmp.lt.s32.totalorder %s2225_s29, %s2225_s29 }
  0x18   : > { %p2043_p13 = scmp.ne.s32.totalorder %s2225_s29, %s2042_s25  ;;  %p2051_p2 = scmp.lt.s32.totalorder %s2042_s25, %s2042_s25 }
  0x1a   : > { %p2045_p0 = pnand %p2043_p13, %p2253_p8  ;;  %p2052_p7 = por %p2051_p2, %p2050_p5 }
  0x1c   : > { %p2046_p1 = pneg %p2045_p0 }
  0x1e   : > { %p2053_p9 = pnand %p2052_p7, %p2046_p1 }
  0x20   : > { %2056 = shalt.err (!%p2053_p9)
}
  0x21   : > { %1983 = dma.hbm_to_vmem [thread:$0]  (!%p2237_p6), %s2493_s3, 128, %s2225_s29, [#allocation9]  }
  0x22   : > { %s2057_s15 = scalar_lea.hbm %s2491_s1, 256 }
  0x23   : > { %p2058_p10 = scmp.ne.s32.totalorder %s2491_s1, %s2057_s15  ;;  %p2064_p12 = scmp.lt.u32.totalorder %s2057_s15, %s2491_s1 }
  0x25   : > { %p2060_p2 = pnand %p2058_p10, %p2253_p8 }
  0x27   : > { %p2061_p11 = pneg %p2060_p2 }
  0x29   : > { %p2066_p13 = pnand %p2064_p12, %p2061_p11 }
  0x2b   : > { %2069 = shalt.err (!%p2066_p13)
}
  0x2c   : > { %s2070_s29 = scalar_lea.vmem %s2233_s11, 256  ;;  %p2078_p7 = scmp.lt.s32.totalorder %s2233_s11, %s2233_s11 }
  0x2d   : > { %p2071_p0 = scmp.ne.s32.totalorder %s2233_s11, %s2070_s29  ;;  %p2079_p9 = scmp.lt.s32.totalorder %s2070_s29, %s2070_s29 }
  0x2f   : > { %p2073_p1 = pnand %p2071_p0, %p2253_p8  ;;  %p2080_p10 = por %p2079_p9, %p2078_p7 }
  0x31   : > { %p2074_p5 = pneg %p2073_p1 }
  0x33   : > { %p2081_p2 = pnand %p2080_p10, %p2074_p5 }
  0x35   : > { %2084 = shalt.err (!%p2081_p2)
}
  0x36   : > { %s2165_s21 = smov 128   ;;  %s2166_s23 = smov 8  }
  0x37   : > { %1980 = dma.hbm_to_vmem [thread:$0]  (!%p2237_p6), %s2491_s1, 256, %s2233_s11, [#allocation7], %s2165_s21, %s2165_s21, %s2166_s23  }
  0x38   : > { %s2085_s10 = scalar_lea.hbm %s2495_s5, 512 }
  0x39   : > { %p2086_p11 = scmp.ne.s32.totalorder %s2495_s5, %s2085_s10  ;;  %p2092_p0 = scmp.lt.u32.totalorder %s2085_s10, %s2495_s5 }
  0x3b   : > { %p2088_p12 = pnand %p2086_p11, %p2253_p8 }
  0x3d   : > { %p2089_p13 = pneg %p2088_p12 }
  0x3f   : > { %p2094_p1 = pnand %p2092_p0, %p2089_p13 }
  0x41   : > { %2097 = shalt.err (!%p2094_p1)
}
  0x42   : > { %s2098_s11 = scalar_lea.vmem %s2241_s14, 512  ;;  %p2106_p10 = scmp.lt.s32.totalorder %s2241_s14, %s2241_s14 }
  0x43   : > { %p2099_p5 = scmp.ne.s32.totalorder %s2241_s14, %s2098_s11  ;;  %p2107_p2 = scmp.lt.s32.totalorder %s2098_s11, %s2098_s11 }
  0x45   : > { %p2101_p7 = pnand %p2099_p5, %p2253_p8  ;;  %p2108_p11 = por %p2107_p2, %p2106_p10 }
  0x47   : > { %p2102_p9 = pneg %p2101_p7 }
  0x49   : > { %p2109_p12 = pnand %p2108_p11, %p2102_p9 }
  0x4b   : > { %2112 = shalt.err (!%p2109_p12)
}
  0x4c   : > { %1986 = dma.hbm_to_vmem [thread:$0]  (!%p2237_p6), %s2495_s5, 512, %s2241_s14, [#allocation9], %s2165_s21, %s2165_s21, %s2166_s23  }
  0x4d   : > { %s2113_s25 = scalar_lea.hbm %s2496_s6, 512 }
  0x4e   : > { %p2114_p13 = scmp.ne.s32.totalorder %s2496_s6, %s2113_s25  ;;  %p2120_p5 = scmp.lt.u32.totalorder %s2113_s25, %s2496_s6 }
  0x50   : > { %p2116_p0 = pnand %p2114_p13, %p2253_p8 }
  0x52   : > { %p2117_p1 = pneg %p2116_p0 }
  0x54   : > { %p2122_p7 = pnand %p2120_p5, %p2117_p1 }
  0x56   : > { %2125 = shalt.err (!%p2122_p7)
}
  0x57   : > { %s2126_s15 = scalar_lea.vmem %s276_s16, 512  ;;  %p2134_p11 = scmp.lt.s32.totalorder %s276_s16, %s276_s16 }
  0x58   : > { %p2127_p9 = scmp.ne.s32.totalorder %s276_s16, %s2126_s15  ;;  %p2135_p12 = scmp.lt.s32.totalorder %s2126_s15, %s2126_s15 }
  0x5a   : > { %p2129_p10 = pnand %p2127_p9, %p2253_p8  ;;  %p2136_p3 = por %p2135_p12, %p2134_p11 }
  0x5c   : > { %p2130_p2 = pneg %p2129_p10 }
  0x5e   : > { %p2137_p4 = pnand %p2136_p3, %p2130_p2 }
  0x60   : > { %2140 = shalt.err (!%p2137_p4)
}
  0x61   : > { %1989 = dma.hbm_to_vmem [thread:$0]  (!%p2237_p6), %s2496_s6, 512, %s276_s16, [#allocation12], %s2165_s21, %s2165_s21, %s2166_s23  }
  0x62   : > { %p2504_p13 = scmp.ne.s32.totalorder %s2501_s9, 0 }
  0x63   : > { %p2505_p8 = scmp.eq.s32.totalorder (!%p2504_p13), %s2219_s30, 0 }
  0x64   : > { %302 = sbr.rel (%p2504_p13) target bundleno = 2898 (0xb52), region = 52 }
  0x6b   : > { %2146 = dma.done.wait (%p2505_p8), [#allocation7], 256   ;;  %p2506_p0 = pmov %p2505_p8 }
  0x6d   : > { %2148 = vsyncadd (%p2506_p0), [#allocation7], 4294967040  ;;  %p2507_p3 = pmov %p2506_p0 }
  0x6e   : > { %p2508_p4 = pmov %p2506_p0 }
  0x6f   : > { %2150 = dma.done.wait (%p2507_p3), [#allocation9], 640  }
  0x70   : > { %2152 = vsyncadd (%p2508_p4), [#allocation9], 4294966656  ;;  %p2509_p1 = pmov %p2506_p0 }
  0x71   : > { %p2510_p6 = pmov %p2506_p0 }
  0x72   : > { %2154 = dma.done.wait (%p2509_p1), [#allocation12], 512  }
  0x73   : > { %2156 = vsyncadd (%p2510_p6), [#allocation12], 4294966784  ;;  %p343_p5 = scmp.lt.s32.totalorder %s2219_s30, 1  ;;  %p2511_p7 = scmp.ne.s32.totalorder %s2219_s30, 0 }
  0x74   : > { %v352_v0 = vld [vmem:[#allocation6] sm:$0xff] (!%p2511_p7)  ;;  %vm354_vm0 = vcmask (!%p2511_p7), 130048   ;;  %v2371_v1 = vld [vmem:[#allocation6 + $0x8] sm:$0xff] (!%p2511_p7)  ;;  %v537_v5 = vld [vmem:[#allocation8] sm:$0xff] (!%p2511_p7)  ;;  %vm538_vm1 = vcmask (!%p2511_p7), 64512   ;;  %vm705_vm2 = vcmask (!%p2511_p7), 261120  }
  0x75   : > { %s344_s9 = scalar_select %p343_p5, %s2219_s30, 1 }
  0x76   : > { %351 = sbr.rel (%p2511_p7) target bundleno = 1383 (0x567), region = 72  ;;  %v523_v2 = vsel (!%p2511_p7), %vm354_vm0, %v352_v0, 0.0  ;;  %1781 = vmatprep.mubr.msk.f32.mxu0 (!%p2511_p7), %vm354_vm0, %v352_v0  ;;  %v526_v3 = vsel (!%p2511_p7), %vm354_vm0, %v2371_v1, 0.0  ;;  %v1891_v4 = vpack.c.bf16 (!%p2511_p7), %v2371_v1, %v352_v0  ;;  %v533_v10 = vld [vmem:[%s2492_s2] sm:$0xff] (!%p2511_p7)  ;;  %v534_v13 = vld [vmem:[%s2492_s2 + $0x8] sm:$0xff] (!%p2511_p7)  ;;  %v703_v31 = vld [vmem:[%s2494_s4 + $0x10] sm:$0xff] (!%p2511_p7) }
  0x77   : > { %s1712_s12 = sshll.u32 %s344_s9, 4  ;;  %524 = vadd.xlane.f32.xlu0 (!%p2511_p7), %v523_v2  ;;  %v701_v28 = vld [vmem:[%s2494_s4] sm:$0xff] (!%p2511_p7)  ;;  %v702_v29 = vld [vmem:[%s2494_s4 + $0x8] sm:$0xff] (!%p2511_p7)  ;;  %v704_v32 = vld [vmem:[%s2494_s4 + $0x18] sm:$0xff] (!%p2511_p7)  ;;  %v2167_v34 = vmov (!%p2511_p7), 0.0  }
  0x78   : > { %s2367_s21 = scalar_lea.vmem %s2490_s0, %s1712_s12  ;;  %1892 = vmatprep.subr.bf16.mxu0 (!%p2511_p7), %v1891_v4  ;;  %v1903_v30 = vpack.c.bf16 (!%p2511_p7), %v702_v29, %v701_v28  ;;  %v1907_v33 = vpack.c.bf16 (!%p2511_p7), %v704_v32, %v703_v31  ;;  %1040 = vst.msk [vmem:[#allocation5] sm:$0xff] (!%p2511_p7), %vm705_vm2, %v2167_v34  ;;  %1041 = vst.msk [vmem:[#allocation5 + $0x8] sm:$0xff] (!%p2511_p7), %vm705_vm2, %v2167_v34  ;;  %v953_v43 = vld [vmem:[#allocation11] sm:$0xff] (!%p2511_p7)  ;;  %v954_v44 = vld [vmem:[#allocation11 + $0x8] sm:$0xff] (!%p2511_p7) }
  0x79   : > { %1894 = vmatpush3.bf16.msra.mxu0 (!%p2511_p7), %v1891_v4  ;;  %v1923_v45 = vpack.c.bf16 (!%p2511_p7), %v954_v44, %v953_v43  ;;  %v864_v46 = vld [vmem:[#allocation10] sm:$0xff] (!%p2511_p7)  ;;  %v865_v47 = vld [vmem:[#allocation10 + $0x8] sm:$0xff] (!%p2511_p7)  ;;  %v866_v52 = vld [vmem:[#allocation10 + $0x10] sm:$0xff] (!%p2511_p7) }
  0x7a   : > { %1791 = vmatprep.subr.mxu0 (!%p2511_p7), %v537_v5  ;;  %v1915_v51 = vpack.c.bf16 (!%p2511_p7), %v865_v47, %v864_v46  ;;  %v867_v53 = vld [vmem:[#allocation10 + $0x18] sm:$0xff] (!%p2511_p7)  ;;  %v955_v54 = vld [vmem:[#allocation11 + $0x10] sm:$0xff] (!%p2511_p7) }
  0x7b   : > { %527 = vadd.xlane.f32.xlu0 (!%p2511_p7), %v526_v3  ;;  %v1919_v55 = vpack.c.bf16 (!%p2511_p7), %v867_v53, %v866_v52  ;;  %v956_v56 = vld [vmem:[#allocation11 + $0x18] sm:$0xff] (!%p2511_p7) }
  0x7c   : > { %1782 = vmatmul.mubr.msk.f32.vlgmr.msra.gmra.mrb[0].mxu0 (!%p2511_p7), %vm354_vm0, %v2371_v1  ;;  %v1927_v57 = vpack.c.bf16 (!%p2511_p7), %v956_v56, %v955_v54 }
  0x7d   : > { %1792 = vmatpush3.msra.mxu0 %v537_v5 }
  0x7e   : > { %1904 = vmatprep.subr.bf16.mxu0 %v1903_v30 }
 0x104   : > { %v525_v6 = vpop.xlane.xlu0 %524 }
 0x105   : > { %v529_v7 = vmax.f32 %v525_v6, 1.0 }
 0x107   : > { %2013 = vrsqrt.f32 %v529_v7 }
 0x108   : > { %v528_v8 = vpop.xlane.xlu0 %527 }
 0x109   : > { %v530_v9 = vmax.f32 %v528_v8, 1.0 }
 0x10b   : > { %2015 = vrsqrt.f32 %v530_v9 }
 0x111   : > { %v2383_v11 = vpop.eup %2013 }
 0x112   : > { %v535_v12 = vmul.f32 %v2383_v11, %v533_v10 }
 0x114   : > { %1793 = vmatprep.mubr.msk.f32.mxu0 %vm538_vm1, %v535_v12 }
 0x115   : > { %v2389_v14 = vpop.eup %2015 }
 0x116   : > { %v536_v15 = vmul.f32 %v2389_v14, %v534_v13 }
 0x118   : > { %1794 = vmatmul.mubr.msk.f32.vlgmr.msra.gmra.mrb[2].mxu0 %vm538_vm1, %v536_v15 }
 0x119   : > { %1906 = vmatpush3.bf16.msra.mxu0 %v1903_v30 }
 0x11a   : > { %1908 = vmatprep.subr.bf16.mxu0 %v1907_v33 }
 0x11d   : > { %1910 = vmatpush3.bf16.msra.mxu0 %v1907_v33 }
 0x11e   : > { %1924 = vmatprep.subr.bf16.mxu0 %v1923_v45 }
 0x14f   : > { %v1783_v16 = vpop.f32.mrb[0].mxu0 }
 0x150   : > { %v427_v17 = vpop.f32.mrb[1].mxu0 }
 0x151   : > { %v1895_v18 = vpack.c.bf16 %v1783_v16, %v427_v17  ;;  %1788 = vmatprep.mubr.msk.f32.mxu1 %vm354_vm0, %v427_v17 }
 0x153   : > { %1896 = vmatprep.subr.bf16.mxu1 %v1895_v18 }
 0x154   : > { %1898 = vmatpush3.bf16.msra.mxu1 %v1895_v18 }
 0x157   : > { %1789 = vmatmul.mubr.msk.f32.vlgmr.msra.gmra.mrb[0].mxu1 %vm354_vm0, %v1783_v16 }
 0x158   : > { %1800 = vmatprep.mubr.msk.f32.mxu1 %vm354_vm0, %v352_v0 }
 0x1eb   : > { %v1795_v19 = vpop.f32.mrb[2].mxu0 }
 0x1ec   : > { %v611_v20 = vpop.f32.mrb[3].mxu0 }
 0x1ed   : > { %v1899_v21 = vpack.c.bf16 %v1795_v19, %v611_v20 }
 0x1ef   : > { %1900 = vmatprep.subr.bf16.mxu1 %v1899_v21 }
 0x1f0   : > { %1902 = vmatpush3.bf16.msra.mxu1 %v1899_v21 }
 0x1f3   : > { %1801 = vmatmul.mubr.msk.f32.vlgmr.msra.gmra.mrb[2].mxu1 %vm354_vm0, %v2371_v1 }
 0x1f4   : > { %1818 = vmatprep.mubr.msk.f32.mxu1 %vm354_vm0, %v352_v0 }
 0x22a   : > { %v1790_v22 = vpop.f32.mrb[0].mxu1 }
 0x22b   : > { %v518_v23 = vmax.f32 %v1790_v22, 0.0  ;;  %v508_v24 = vpop.f32.mrb[1].mxu1 }
 0x22c   : > { %v517_v25 = vmax.f32 %v508_v24, 0.0 }
 0x22d   : > { %v520_v26 = vmin.f32 %v518_v23, 1.0 }
 0x22e   : > { %v519_v27 = vmin.f32 %v517_v25, 1.0 }
 0x22f   : > { %522 = vst.msk [vmem:[#allocation2 + $0x8] sm:$0xff] %vm354_vm0, %v520_v26 }
 0x230   : > { %521 = vst.msk [vmem:[#allocation2] sm:$0xff] %vm354_vm0, %v519_v27 }
 0x2c6   : > { %v1802_v35 = vpop.f32.mrb[2].mxu1 }
 0x2c7   : > { %v696_v36 = vmul.f32 %v2389_v14, %v1802_v35  ;;  %v686_v37 = vpop.f32.mrb[3].mxu1 }
 0x2c8   : > { %v695_v38 = vmul.f32 %v2383_v11, %v686_v37 }
 0x2c9   : > { %v698_v39 = vmax.f32 %v696_v36, 0.0 }
 0x2ca   : > { %v697_v40 = vmax.f32 %v695_v38, 0.0 }
 0x2cb   : > { %v700_v42 = vmul.f32 %v2389_v14, %v698_v39 }
 0x2cc   : > { %v699_v41 = vmul.f32 %v2383_v11, %v697_v40 }
 0x2ce   : > { %1811 = vmatprep.mubr.msk.f32.mxu0 %vm705_vm2, %v699_v41 }
 0x2cf   : > { %1812 = vmatmul.mubr.msk.f32.vlgmr.msra.gmra.mrb[4].mxu0 %vm705_vm2, %v700_v42 }
 0x2d0   : > { %1926 = vmatpush3.bf16.msra.mxu0 %v1923_v45 }
 0x2d1   : > { %1928 = vmatprep.subr.bf16.mxu0 %v1927_v57 }
 0x2d4   : > { %1930 = vmatpush3.bf16.msra.mxu0 %v1927_v57 }
 0x3a2   : > { %v1813_v48 = vpop.f32.mrb[4].mxu0 }
 0x3a3   : > { %v778_v49 = vpop.f32.mrb[5].mxu0 }
 0x3a4   : > { %v1911_v50 = vpack.c.bf16 %v1813_v48, %v778_v49 }
 0x3a6   : > { %1912 = vmatprep.subr.bf16.mxu1 %v1911_v50 }
 0x3a7   : > { %1914 = vmatpush3.bf16.msra.mxu1 %v1911_v50 }
 0x3a8   : > { %1916 = vmatprep.subr.bf16.mxu1 %v1915_v51 }
 0x3aa   : > { %1819 = vmatmul.mubr.msk.f32.vlgmr.msra.gmra.mrb[4].mxu1 %vm354_vm0, %v2371_v1 }
 0x3ab   : > { %1918 = vmatpush3.bf16.msra.mxu1 %v1915_v51 }
 0x3ac   : > { %1920 = vmatprep.subr.bf16.mxu1 %v1919_v55 }
 0x3af   : > { %1922 = vmatpush3.bf16.msra.mxu1 %v1919_v55 }
 0x47d   : > { %v1820_v58 = vpop.f32.mrb[4].mxu1 }
 0x47e   : > { %v853_v59 = vpop.f32.mrb[5].mxu1  ;;  %v863_v61 = vmul.f32 %v2389_v14, %v1820_v58 }
 0x47f   : > { %v862_v60 = vmul.f32 %v2383_v11, %v853_v59 }
 0x481   : > { %1829 = vmatprep.mubr.msk.f32.mxu1 %vm705_vm2, %v862_v60  ;;  %1840 = vmatprep.mubr.msk.f32.mxu0 %vm705_vm2, %v862_v60 }
 0x482   : > { %1830 = vmatmul.mubr.msk.f32.vlgmr.msra.gmra.mrb[6].mxu1 %vm705_vm2, %v863_v61  ;;  %1841 = vmatmul.mubr.msk.f32.vlgmr.msra.gmra.mrb[6].mxu0 %vm705_vm2, %v863_v61 }
 0x555   : > { %v1831_v62 = vpop.f32.mrb[6].mxu1  ;;  %v1842_v63 = vpop.f32.mrb[6].mxu0 }
 0x556   : > { %v950_v0 = vmul.f32 0.4204482, %v1831_v62  ;;  %v1034_v1 = vmul.f32 1.442695, %v1842_v63  ;;  %v940_v2 = vpop.f32.mrb[7].mxu1  ;;  %v1023_v3 = vpop.f32.mrb[7].mxu0 }
 0x557   : > { %v949_v4 = vmul.f32 0.4204482, %v940_v2  ;;  %v1032_v5 = vmul.f32 1.442695, %v1023_v3 }
 0x558   : > { %952 = vst.msk [vmem:[#allocation3 + $0x8] sm:$0xff] %vm705_vm2, %v950_v0  ;;  %2017 = vpow2.f32 %v1034_v1 }
 0x559   : > { %951 = vst.msk [vmem:[#allocation3] sm:$0xff] %vm705_vm2, %v949_v4  ;;  %2019 = vpow2.f32 %v1032_v5 }
 0x562   : > { %v2018_v6 = vpop.eup %2017 }
 0x563   : > { %v2020_v7 = vpop.eup %2019  ;;  %v1037_v8 = vmul.f32 0.4204482, %v2018_v6 }
 0x564   : > { %v1036_v9 = vmul.f32 0.4204482, %v2020_v7 }
 0x565   : > { %1039 = vst.msk [vmem:[#allocation4 + $0x8] sm:$0xff] %vm705_vm2, %v1037_v8 }
 0x566   : > { %1038 = vst.msk [vmem:[#allocation4] sm:$0xff] %vm705_vm2, %v1036_v9 }
 0x567 PF: > { %v1042_v10 = vld [vmem:[%s2367_s21] sm:$0xff]  ;;  %v1043_v11 = vld [vmem:[%s2367_s21 + $0x8] sm:$0xff]  ;;  %v1044_v12 = vld [vmem:[#allocation3] sm:$0xff]  ;;  %vm1052_vm3 = vcmask 261120   ;;  %vm1146_vm5 = vcmask 130048   ;;  %vm1162_vm6 = vcmask 64512  }
 0x568   : > { %v1045_v13 = vld [vmem:[#allocation3 + $0x8] sm:$0xff]  ;;  %vm1932_vm4 = vmpackc.low %vm1052_vm3, %vm1052_vm3  ;;  %v1142_v29 = vld [vmem:[#allocation2] sm:$0xff]  ;;  %p1707_p9 = scmp.ne.s32.totalorder %s2219_s30, 1 }
 0x569   : > { %v1143_v32 = vld [vmem:[#allocation2 + $0x8] sm:$0xff]  ;;  %v1161_v37 = vld [vmem:[#allocation8] sm:$0xff]  ;;  %v1157_v42 = vld [vmem:[%s2492_s2] sm:$0xff]  ;;  %vm1592_vm7 = vcmask (!%p1707_p9), 31744  }
 0x56a   : > { %1850 = vmatprep.subr.mxu1 %v1161_v37  ;;  %v1158_v45 = vld [vmem:[%s2492_s2 + $0x8] sm:$0xff]  ;;  %v1331_v51 = vld [vmem:[%s2494_s4] sm:$0xff]  ;;  %v1333_v54 = vld [vmem:[%s2494_s4 + $0x10] sm:$0xff] }
 0x56b   : > { %1851 = vmatpush3.msra.mxu1 %v1161_v37  ;;  %v1332_v52 = vld [vmem:[%s2494_s4 + $0x8] sm:$0xff]  ;;  %v1334_v55 = vld [vmem:[%s2494_s4 + $0x18] sm:$0xff]  ;;  %v1493_v8 = vld [vmem:[#allocation5] sm:$0xff] }
 0x56c   : > { %v1047_v15 = vld [vmem:[#allocation4 + $0x8] sm:$0xff]  ;;  %v1941_v53 = vpack.c.bf16 %v1332_v52, %v1331_v51  ;;  %v1945_v56 = vpack.c.bf16 %v1334_v55, %v1333_v54  ;;  %v1494_v5 = vld [vmem:[#allocation5 + $0x8] sm:$0xff] }
 0x56d   : > { %v1046_v14 = vld [vmem:[#allocation4] sm:$0xff]  ;;  %v1049_v17 = vmul.f32 %v1047_v15, %v1043_v11 }
 0x56e   : > { %v1048_v16 = vmul.f32 %v1046_v14, %v1042_v10  ;;  %v1509_v14 = vld [vmem:[%s2497_s7 + $0x10] sm:$0xff] (!%p1707_p9) }
 0x56f   : > { %v1051_v19 = vadd.f32 %v1049_v17, %v1045_v13  ;;  %v1508_v13 = vld [vmem:[%s2497_s7 + $0x8] sm:$0xff] (!%p1707_p9) }
 0x570   : > { %v1050_v18 = vadd.f32 %v1048_v16, %v1044_v12  ;;  %v1507_v12 = vld [vmem:[%s2497_s7] sm:$0xff] (!%p1707_p9)  ;;  %v1510_v16 = vld [vmem:[%s2497_s7 + $0x18] sm:$0xff] (!%p1707_p9) }
 0x571   : > { %v1953_v15 = vpack.c.bf16 (!%p1707_p9), %v1508_v13, %v1507_v12 }
 0x572   : > { %v1931_v20 = vpack.c.bf16 %v1051_v19, %v1050_v18  ;;  %1847 = vmatprep.mubr.msk.f32.mxu0 %vm1052_vm3, %v1050_v18  ;;  %v1957_v18 = vpack.c.bf16 (!%p1707_p9), %v1510_v16, %v1509_v14 }
 0x574   : > { %1933 = vmatprep.subr.msk.bf16.mxu0 %vm1932_vm4, %v1931_v20 }
 0x575   : > { %1936 = vmatpush3.bf16.xpose.msk.msra.mxu0 %vm1932_vm4, %v1931_v20 }
 0x57c   : > { %1848 = vmatmul.mubr.msk.f32.vlgmr.msra.gmra.mrb[0].mxu0 %vm1052_vm3, %v1051_v19 }
 0x64f   : > { %v1849_v21 = vpop.f32.mrb[0].mxu0 }
 0x650   : > { %v1135_v22 = vmul.f32 0.5, %v1849_v21  ;;  %v1125_v23 = vpop.f32.mrb[1].mxu0 }
 0x651   : > { %v1134_v24 = vmul.f32 0.5, %v1125_v23 }
 0x652   : > { %2021 = vtanh.f32 %v1135_v22 }
 0x653   : > { %2023 = vtanh.f32 %v1134_v24 }
 0x65c   : > { %v2022_v25 = vpop.eup %2021 }
 0x65d   : > { %v2024_v26 = vpop.eup %2023  ;;  %v1139_v27 = vadd.f32 1.0, %v2022_v25 }
 0x65e   : > { %v1138_v28 = vadd.f32 1.0, %v2024_v26 }
 0x65f   : > { %v1141_v30 = vmul.f32 0.5, %v1139_v27 }
 0x660   : > { %v1140_v31 = vmul.f32 0.5, %v1138_v28 }
 0x661   : > { %v1145_v35 = vmul.f32 %v1143_v32, %v1141_v30 }
 0x662   : > { %v1144_v33 = vmul.f32 %v1142_v29, %v1140_v31 }
 0x663   : > { %v1150_v36 = vsel %vm1146_vm5, %v1145_v35, 0.0 }
 0x664   : > { %1877 = vmatprep.mubr.msk.f32.mxu0 %vm1146_vm5, %v1144_v33  ;;  %v1147_v34 = vsel %vm1146_vm5, %v1144_v33, 0.0 }
 0x665   : > { %1148 = vadd.xlane.f32.xlu0 %v1147_v34 }
 0x669   : > { %1151 = vadd.xlane.f32.xlu0 %v1150_v36 }
 0x6f2   : > { %v1149_v38 = vpop.xlane.xlu0 %1148 }
 0x6f3   : > { %v1153_v39 = vmax.f32 %v1149_v38, 1.0 }
 0x6f5   : > { %2025 = vrsqrt.f32 %v1153_v39 }
 0x6f6   : > { %v1152_v40 = vpop.xlane.xlu0 %1151 }
 0x6f7   : > { %v1154_v41 = vmax.f32 %v1152_v40, 1.0 }
 0x6f9   : > { %2027 = vrsqrt.f32 %v1154_v41 }
 0x6ff   : > { %v2026_v43 = vpop.eup %2025 }
 0x700   : > { %v1159_v44 = vmul.f32 %v2026_v43, %v1157_v42 }
 0x702   : > { %1852 = vmatprep.mubr.msk.f32.mxu1 %vm1162_vm6, %v1159_v44 }
 0x703   : > { %v2028_v46 = vpop.eup %2027 }
 0x704   : > { %v1160_v47 = vmul.f32 %v2028_v46, %v1158_v45 }
 0x706   : > { %1853 = vmatmul.mubr.msk.f32.vlgmr.msra.gmra.mrb[0].mxu1 %vm1162_vm6, %v1160_v47 }
 0x707   : > { %1859 = vmatprep.mubr.msk.f32.mxu1 %vm1146_vm5, %v1144_v33 }
 0x7d9   : > { %v1854_v48 = vpop.f32.mrb[0].mxu1 }
 0x7da   : > { %v1235_v49 = vpop.f32.mrb[1].mxu1 }
 0x7db   : > { %v1937_v50 = vpack.c.bf16 %v1854_v48, %v1235_v49 }
 0x7dd   : > { %1938 = vmatprep.subr.bf16.mxu1 %v1937_v50 }
 0x7de   : > { %1940 = vmatpush3.bf16.msra.mxu1 %v1937_v50 }
 0x7df   : > { %1942 = vmatprep.subr.bf16.mxu1 %v1941_v53 }
 0x7e1   : > { %1860 = vmatmul.mubr.msk.f32.vlgmr.msra.gmra.mrb[2].mxu1 %vm1146_vm5, %v1145_v35 }
 0x7e2   : > { %1944 = vmatpush3.bf16.msra.mxu1 %v1941_v53 }
 0x7e3   : > { %1946 = vmatprep.subr.bf16.mxu1 %v1945_v56 }
 0x7e6   : > { %1948 = vmatpush3.bf16.msra.mxu1 %v1945_v56 }
 0x8b4   : > { %v1861_v57 = vpop.f32.mrb[2].mxu1 }
 0x8b5   : > { %v1326_v58 = vmul.f32 %v2028_v46, %v1861_v57  ;;  %v1316_v59 = vpop.f32.mrb[3].mxu1 }
 0x8b6   : > { %v1325_v60 = vmul.f32 %v2026_v43, %v1316_v59 }
 0x8b7   : > { %v1328_v61 = vmax.f32 %v1326_v58, 0.0 }
 0x8b8   : > { %v1327_v62 = vmax.f32 %v1325_v60, 0.0 }
 0x8b9   : > { %v1330_v0 = vmul.f32 %v2028_v46, %v1328_v61 }
 0x8ba   : > { %v1329_v63 = vmul.f32 %v2026_v43, %v1327_v62 }
 0x8bc   : > { %1870 = vmatprep.mubr.msk.f32.mxu1 %vm1052_vm3, %v1329_v63 }
 0x8bd   : > { %1871 = vmatmul.mubr.msk.f32.vlgmr.msra.gmra.mrb[4].mxu1 %vm1052_vm3, %v1330_v0 }
 0x990   : > { %v1872_v1 = vpop.f32.mrb[4].mxu1 }
 0x991   : > { %v1407_v2 = vpop.f32.mrb[5].mxu1 }
 0x992   : > { %v1949_v3 = vpack.c.bf16 %v1872_v1, %v1407_v2 }
 0x994   : > { %1950 = vmatprep.subr.bf16.mxu0 %v1949_v3 }
 0x995   : > { %1952 = vmatpush3.bf16.msra.mxu0 %v1949_v3 }
 0x996   : > { %1954 = vmatprep.subr.bf16.mxu0 (!%p1707_p9), %v1953_v15 }
 0x998   : > { %1878 = vmatmul.mubr.msk.f32.vlgmr.msra.gmra.mrb[2].mxu0 %vm1146_vm5, %v1145_v35 }
 0x999   : > { %1956 = vmatpush3.bf16.msra.mxu0 (!%p1707_p9), %v1953_v15 }
 0x99a   : > { %1958 = vmatprep.subr.bf16.mxu0 (!%p1707_p9), %v1957_v18 }
 0x99d   : > { %1960 = vmatpush3.bf16.msra.mxu0 (!%p1707_p9), %v1957_v18 }
 0xa6b   : > { %v1879_v4 = vpop.f32.mrb[2].mxu0  ;;  %1502 = sbr.rel (%p1707_p9) target bundleno = 2898 (0xb52), region = 76 }
 0xa6c   : > { %v1492_v6 = vmul.f32 %v2028_v46, %v1879_v4  ;;  %v1482_v7 = vpop.f32.mrb[3].mxu0 }
 0xa6d   : > { %v1491_v9 = vmul.f32 %v2026_v43, %v1482_v7 }
 0xa6e   : > { %v1496_v10 = vadd.f32 %v1494_v5, %v1492_v6 }
 0xa6f   : > { %v1495_v11 = vadd.f32 %v1493_v8, %v1491_v9 }
 0xa70   : > { %1498 = vst.msk [vmem:[#allocation5 + $0x8] sm:$0xff] %vm1052_vm3, %v1496_v10 }
 0xa71   : > { %1497 = vst.msk [vmem:[#allocation5] sm:$0xff] %vm1052_vm3, %v1495_v11 }
 0xa77   : > { %v1504_v20 = vld [vmem:[#allocation5 + $0x8] sm:$0xff] }
 0xa78   : > { %v1503_v17 = vld [vmem:[#allocation5] sm:$0xff]  ;;  %v1506_v21 = vmul.f32 0.5, %v1504_v20 }
 0xa79   : > { %v1505_v19 = vmul.f32 0.5, %v1503_v17 }
 0xa7b   : > { %1888 = vmatprep.mubr.msk.f32.mxu0 %vm1052_vm3, %v1505_v19 }
 0xa7c   : > { %1889 = vmatmul.mubr.msk.f32.vlgmr.msra.gmra.mrb[0].mxu0 %vm1052_vm3, %v1506_v21 }
 0xb4f   : > { %v1890_v22 = vpop.f32.mrb[0].mxu0 }
 0xb50   : > { %1594 = vst.msk [vmem:[%s2498_s8 + $0x8] sm:$0xff] %vm1592_vm7, %v1890_v22  ;;  %v1583_v23 = vpop.f32.mrb[1].mxu0 }
 0xb51   : > { %1593 = vst.msk [vmem:[%s2498_s8] sm:$0xff] %vm1592_vm7, %v1583_v23 }
 0xb52 PF: > { %s21_s27 = sadd.s32 1, %s2159_s27  }
 0xb53   : > { %p18_p10 = scmp.ge.s32.totalorder %s21_s27, 4  }
 0xb55   :  { %20 = sbr.rel (!%p18_p10) target bundleno = 3 (0x3), region = 103 }
 0xb5c   :  { %1606 = vsyncpa [#allocation7], 1 }
 0xb5d   :  { %1608 = vsyncpa [#allocation7 + $0x1], 1 }
 0xb5e   :  { %1609 = vsyncpa [#allocation9], 1 }
 0xb5f   :  { %1610 = vsyncpa [#allocation12], 1 }

</bundles_post_ra>
